<compile_context>
chip_gen: v7x
topology: tpu7x:2x2x1
jax: 0.10.0
libtpu: 0.0.40
codegen_flags: <defaults>
</compile_context>

<pallas_src>
import math

import jax
import jax.numpy as jnp
from jax.experimental import pallas as pl
from jax.experimental.pallas import tpu as pltpu


# ---------------------------------------------------------------------------
# Fused kernel: chains (matmul + bias + ELU) x n_hidden, then a bias-free
# matmul.  Intermediates stay on-chip; only x-tile in, out-tile out.
# ---------------------------------------------------------------------------
def _make_fused_mlp_kernel(n_hidden, compute_dtype):
    """Returns kernel(x_ref, w0, b0, w1, b1, ..., w_last, o_ref)."""

    def kernel(x_ref, *refs):
        o_ref = refs[-1]
        prefs = refs[:-1]

        h = x_ref[...]  # (tb, Din), already compute_dtype
        pi = 0
        for _ in range(n_hidden):
            w_ref = prefs[pi]
            b_ref = prefs[pi + 1]
            pi += 2
            # MXU matmul in compute_dtype, f32 accumulation.
            y = jnp.dot(h, w_ref[...], preferred_element_type=jnp.float32)
            y = y + b_ref[...]  # bias kept in f32
            # ELU(alpha=1) in f32 (exp goes to the EUP slot).
            # Note: jnp.exp(y)-1 rather than expm1 -- expm1 lowering support
            # in Mosaic is not guaranteed; the where() masks the large-y branch
            # so no NaN/inf propagates.
            y = jnp.where(y > 0, y, jnp.exp(y) - 1.0)
            h = y.astype(compute_dtype)

        w_last = prefs[pi]
        out = jnp.dot(h, w_last[...], preferred_element_type=jnp.float32)
        o_ref[...] = out.astype(o_ref.dtype)

    return kernel


# ---------------------------------------------------------------------------
# Wrapper: builds specs, tiles over batch, keeps weights VMEM-resident.
# ---------------------------------------------------------------------------
def mlp_forward(params, x, *, compute_dtype=jnp.bfloat16, tb=None):
    """Forward pass of MLP([Din, h1, ..., Dout]) fused into one pallas_call."""
    B, Din = x.shape
    n_layers = len(params)
    n_hidden = n_layers - 1
    dims = [Din] + [w.shape[1] for (w, _) in params]
    Dout = dims[-1]

    # Batch tile: big enough to pipeline / shard across TCs, sublane aligned.
    if tb is None:
        tb = min(B, 512)
    tb = min(tb, B)
    if tb < B:
        tb = max(8, (tb // 8) * 8)
    grid = (pl.cdiv(B, tb),)

    # Operands: x tile (tiled over batch) + all weights/biases (constant
    # index_maps -> fetched once, resident across the whole grid).
    operands = [x.astype(compute_dtype)]
    in_specs = [pl.BlockSpec((tb, Din), lambda i: (i, 0))]
    for w_t, b in params:
        operands.append(w_t.astype(compute_dtype))
        in_specs.append(pl.BlockSpec(w_t.shape, lambda i: (0, 0)))
        if b is not None:
            b2d = b.reshape(1, -1).astype(jnp.float32)
            operands.append(b2d)
            in_specs.append(pl.BlockSpec(b2d.shape, lambda i: (0, 0)))

    out_spec = pl.BlockSpec((tb, Dout), lambda i: (i, 0))
    out_shape = jax.ShapeDtypeStruct((B, Dout), jnp.float32)

    # Rough VMEM budget: double-buffered x/out tiles + resident params +
    # in-flight f32 intermediates.  Raise above v5e's 16 MiB default scoped
    # limit, stay well under v7x's 64 MiB physical VMEM.
    cbytes = jnp.dtype(compute_dtype).itemsize
    param_bytes = sum(int(o.size) * jnp.dtype(o.dtype).itemsize for o in operands[1:])
    act_bytes = 2 * tb * max(dims) * 4
    est = 2 * (tb * Din * cbytes + tb * Dout * 4) + 2 * param_bytes + act_bytes
    vmem_limit = int(min(max(4 * est, 32 << 20), 48 << 20))
    # TODO(synk): for very large layer sizes, tile Dout/K of the weights and
    # single-buffer them (pipeline_mode=pl.Buffered(1)) to fit v7x's 64 MiB.

    kernel = _make_fused_mlp_kernel(n_hidden, compute_dtype)

    return pl.pallas_call(
        kernel,
        out_shape=out_shape,
        grid=grid,
        in_specs=in_specs,
        out_specs=out_spec,
        compiler_params=pltpu.CompilerParams(
            dimension_semantics=("parallel",),
            vmem_limit_bytes=vmem_limit,
        ),
    )(*operands)


# ---------------------------------------------------------------------------
# Parameter init mirroring torch.nn.Linear (U(-1/sqrt(fan_in), +)), weights
# stored pre-transposed as (din, dout).  Final layer has no bias.
# ---------------------------------------------------------------------------
def init_mlp_params(key, layers):
    params = []
    dims = list(zip(layers[:-1], layers[1:]))
    for li, (din, dout) in enumerate(dims):
        key, kw, kb = jax.random.split(key, 3)
        bound = 1.0 / math.sqrt(din)
        w_t = jax.random.uniform(kw, (din, dout), jnp.float32, -bound, bound)
        is_last = li == len(dims) - 1
        b = (
            None
            if is_last
            else jax.random.uniform(kb, (dout,), jnp.float32, -bound, bound)
        )
        params.append((w_t, b))
    return params


def mlp_reference(params, x):
    """Pure-JAX f32 reference for correctness checking."""
    h = x
    n = len(params)
    for li, (w_t, b) in enumerate(params):
        y = h @ w_t
        if li < n - 1:
            y = y + b
            y = jnp.where(y > 0, y, jnp.exp(y) - 1.0)
        h = y
    return h


if __name__ == "__main__":
    # MLP([32, 64, 48, 16]) -> two hidden Linear+ELU layers, final bias-free.
    layers = [32, 64, 48, 16]
    batch = 64  # tiled as 4 batch blocks of 16 -> multi-step parallel grid

    key = jax.random.PRNGKey(0)
    key, kx = jax.random.split(key)
    x = jax.random.normal(kx, (batch, layers[0]), jnp.float32)
    params = init_mlp_params(key, layers)

    ref = mlp_reference(params, x)

    # 1) f32 compute path: matches the PyTorch/f32 reference tightly.
    out_f32 = jax.block_until_ready(
        mlp_forward(params, x, compute_dtype=jnp.float32, tb=16)
    )
    assert out_f32.shape == (batch, layers[-1])
    assert jnp.allclose(out_f32, ref, atol=1e-4, rtol=1e-4)

    # 2) Default bf16-MXU path (f32 accumulation / bias / ELU).
    out_bf16 = jax.block_until_ready(mlp_forward(params, x, tb=16))
    assert out_bf16.shape == (batch, layers[-1])
    assert jnp.allclose(out_bf16, ref, atol=5e-2, rtol=5e-2)

    print("KERNEL_OK")
</pallas_src>

<mosaic_0001>
module attributes {stable_mosaic.version = 11 : i64} {
  func.func @kernel(%arg0: i32, %arg1: memref<16x32xf32, #tpu.memory_space<vmem>>, %arg2: memref<32x64xf32, #tpu.memory_space<vmem>>, %arg3: memref<1x64xf32, #tpu.memory_space<vmem>>, %arg4: memref<64x48xf32, #tpu.memory_space<vmem>>, %arg5: memref<1x48xf32, #tpu.memory_space<vmem>>, %arg6: memref<48x16xf32, #tpu.memory_space<vmem>>, %arg7: memref<16x16xf32, #tpu.memory_space<vmem>>) attributes {dimension_semantics = [#tpu.dimension_semantics<parallel>], iteration_bounds = array<i64: 4>, scalar_prefetch = 0 : i64, scratch_operands = 0 : i64, tpu.core_type = #tpu.core_type<tc>, window_params = [{transform_indices = @transform_0, window_bounds = array<i64: 16, 32>}, {pipeline_mode = #tpu.pipeline_mode<synchronous>, transform_indices = @transform_1, window_bounds = array<i64: 32, 64>}, {pipeline_mode = #tpu.pipeline_mode<synchronous>, transform_indices = @transform_2, window_bounds = array<i64: 1, 64>}, {pipeline_mode = #tpu.pipeline_mode<synchronous>, transform_indices = @transform_3, window_bounds = array<i64: 64, 48>}, {pipeline_mode = #tpu.pipeline_mode<synchronous>, transform_indices = @transform_4, window_bounds = array<i64: 1, 48>}, {pipeline_mode = #tpu.pipeline_mode<synchronous>, transform_indices = @transform_5, window_bounds = array<i64: 48, 16>}, {transform_indices = @transform_6, window_bounds = array<i64: 16, 16>}]} {
    %c0 = arith.constant 0 : index
    %c0_0 = arith.constant 0 : index
    %0 = vector.load %arg1[%c0, %c0_0] : memref<16x32xf32, #tpu.memory_space<vmem>>, vector<16x32xf32>
    %c0_1 = arith.constant 0 : index
    %c0_2 = arith.constant 0 : index
    %1 = vector.load %arg2[%c0_1, %c0_2] : memref<32x64xf32, #tpu.memory_space<vmem>>, vector<32x64xf32>
    %cst = arith.constant dense<0.000000e+00> : vector<16x64xf32>
    %2 = tpu.matmul %0, %1, %cst {dimension_numbers = #tpu.dot_dimension_numbers<[1], [0], [0], [1], [0, 0, 1, 1], [], []>} : vector<16x32xf32>, vector<32x64xf32>, vector<16x64xf32> -> vector<16x64xf32>
    %c0_3 = arith.constant 0 : index
    %c0_4 = arith.constant 0 : index
    %3 = vector.load %arg3[%c0_3, %c0_4] : memref<1x64xf32, #tpu.memory_space<vmem>>, vector<1x64xf32>
    %4 = vector.broadcast %3 : vector<1x64xf32> to vector<16x64xf32>
    %5 = arith.addf %2, %4 : vector<16x64xf32>
    %cst_5 = arith.constant 0.000000e+00 : f32
    %6 = vector.broadcast %cst_5 : f32 to vector<16x64xf32>
    %7 = arith.cmpf ogt, %5, %6 : vector<16x64xf32>
    %8 = math.exp %5 : vector<16x64xf32>
    %cst_6 = arith.constant 1.000000e+00 : f32
    %9 = vector.broadcast %cst_6 : f32 to vector<16x64xf32>
    %10 = arith.subf %8, %9 : vector<16x64xf32>
    %11 = arith.select %7, %5, %10 : vector<16x64xi1>, vector<16x64xf32>
    %c0_7 = arith.constant 0 : index
    %c0_8 = arith.constant 0 : index
    %12 = vector.load %arg4[%c0_7, %c0_8] : memref<64x48xf32, #tpu.memory_space<vmem>>, vector<64x48xf32>
    %cst_9 = arith.constant dense<0.000000e+00> : vector<16x48xf32>
    %13 = tpu.matmul %11, %12, %cst_9 {dimension_numbers = #tpu.dot_dimension_numbers<[1], [0], [0], [1], [0, 0, 1, 1], [], []>} : vector<16x64xf32>, vector<64x48xf32>, vector<16x48xf32> -> vector<16x48xf32>
    %c0_10 = arith.constant 0 : index
    %c0_11 = arith.constant 0 : index
    %14 = vector.load %arg5[%c0_10, %c0_11] : memref<1x48xf32, #tpu.memory_space<vmem>>, vector<1x48xf32>
    %15 = vector.broadcast %14 : vector<1x48xf32> to vector<16x48xf32>
    %16 = arith.addf %13, %15 : vector<16x48xf32>
    %cst_12 = arith.constant 0.000000e+00 : f32
    %17 = vector.broadcast %cst_12 : f32 to vector<16x48xf32>
    %18 = arith.cmpf ogt, %16, %17 : vector<16x48xf32>
    %19 = math.exp %16 : vector<16x48xf32>
    %cst_13 = arith.constant 1.000000e+00 : f32
    %20 = vector.broadcast %cst_13 : f32 to vector<16x48xf32>
    %21 = arith.subf %19, %20 : vector<16x48xf32>
    %22 = arith.select %18, %16, %21 : vector<16x48xi1>, vector<16x48xf32>
    %c0_14 = arith.constant 0 : index
    %c0_15 = arith.constant 0 : index
    %23 = vector.load %arg6[%c0_14, %c0_15] : memref<48x16xf32, #tpu.memory_space<vmem>>, vector<48x16xf32>
    %cst_16 = arith.constant dense<0.000000e+00> : vector<16x16xf32>
    %24 = tpu.matmul %22, %23, %cst_16 {dimension_numbers = #tpu.dot_dimension_numbers<[1], [0], [0], [1], [0, 0, 1, 1], [], []>} : vector<16x48xf32>, vector<48x16xf32>, vector<16x16xf32> -> vector<16x16xf32>
    %c0_17 = arith.constant 0 : index
    %c0_18 = arith.constant 0 : index
    %25 = vector.load %arg7[%c0_17, %c0_18] : memref<16x16xf32, #tpu.memory_space<vmem>>, vector<16x16xf32>
    tpu.vector_store %arg7[%c0_17, %c0_18], %24 {strides = array<i32>} : memref<16x16xf32, #tpu.memory_space<vmem>>, vector<16x16xf32>,
    return
  }
  func.func @transform_0(%arg0: i32) -> (i32, i32) {
    %c0_i32 = arith.constant 0 : i32
    %c0_i32_0 = arith.constant 0 : i32
    return %arg0, %c0_i32 : i32, i32
  }
  func.func @transform_1(%arg0: i32) -> (i32, i32) {
    %c0_i32 = arith.constant 0 : i32
    %c0_i32_0 = arith.constant 0 : i32
    %c0_i32_1 = arith.constant 0 : i32
    return %c0_i32, %c0_i32_0 : i32, i32
  }
  func.func @transform_2(%arg0: i32) -> (i32, i32) {
    %c0_i32 = arith.constant 0 : i32
    %c0_i32_0 = arith.constant 0 : i32
    %c0_i32_1 = arith.constant 0 : i32
    return %c0_i32, %c0_i32_0 : i32, i32
  }
  func.func @transform_3(%arg0: i32) -> (i32, i32) {
    %c0_i32 = arith.constant 0 : i32
    %c0_i32_0 = arith.constant 0 : i32
    %c0_i32_1 = arith.constant 0 : i32
    return %c0_i32, %c0_i32_0 : i32, i32
  }
  func.func @transform_4(%arg0: i32) -> (i32, i32) {
    %c0_i32 = arith.constant 0 : i32
    %c0_i32_0 = arith.constant 0 : i32
    %c0_i32_1 = arith.constant 0 : i32
    return %c0_i32, %c0_i32_0 : i32, i32
  }
  func.func @transform_5(%arg0: i32) -> (i32, i32) {
    %c0_i32 = arith.constant 0 : i32
    %c0_i32_0 = arith.constant 0 : i32
    %c0_i32_1 = arith.constant 0 : i32
    return %c0_i32, %c0_i32_0 : i32, i32
  }
  func.func @transform_6(%arg0: i32) -> (i32, i32) {
    %c0_i32 = arith.constant 0 : i32
    %c0_i32_0 = arith.constant 0 : i32
    return %arg0, %c0_i32 : i32, i32
  }
}

</mosaic_0001>

<bundles_post_ra>
// kernel: tpu_custom_call.1
= control target key start
LH: loop header
LB: loop body
LE: loop exit
PB: predicated region body
PF: predicated region fallthrough
CT: control target
= control target key end

     0   :  { %s801_s21 = smov 0   ;;  %s885_s0 = inlined_call_operand.vmem [shape: f32[64,32], index: 0, kind: input, shape index: {}]   ;;  %s886_s1 = inlined_call_operand.vmem [shape: f32[32,64], index: 1, kind: input, shape index: {}]   ;;  %s887_s2 = inlined_call_operand.vmem [shape: f32[1,64], index: 2, kind: input, shape index: {}]   ;;  %s888_s3 = inlined_call_operand.vmem [shape: f32[64,48], index: 3, kind: input, shape index: {}]   ;;  %s889_s4 = inlined_call_operand.vmem [shape: f32[1,48], index: 4, kind: input, shape index: {}]   ;;  %s890_s5 = inlined_call_operand.vmem [shape: f32[48,16], index: 5, kind: input, shape index: {}]   ;;  %s891_s6 = inlined_call_operand.vmem [shape: f32[64,16], index: 6, kind: output, shape index: {}]  }
   0x1 LB: > { %s614_s22 = sadd.s32 4294967295, %s764_s21   ;;  %p618_p0 = scmp.ge.s32.totalorder %s764_s21, 1  ;;  %s764_s21 = sphi %s801_s21, %s16_s21  }
   0x2   : > { %p213_p1 = scmp.lt.s32.totalorder %s764_s21, 5 }
   0x4   : > { %p214_p2 = pnand %p618_p0, %p213_p1 }
   0x5   : > { %v257_v0 = vld [vmem:[%s886_s1] sm:$0xff] (!%p214_p2)  ;;  %v258_v1 = vld [vmem:[%s886_s1 + $0x8] sm:$0xff] (!%p214_p2)  ;;  %v259_v2 = vld [vmem:[%s886_s1 + $0x10] sm:$0xff] (!%p214_p2)  ;;  %s619_s29 = sshll.u32 (!%p214_p2), %s614_s22, 1  ;;  %vm268_vm0 = vcmask (!%p214_p2), 261120   ;;  %vm375_vm1 = vcmask (!%p214_p2), 523264  }
   0x6   : > { %217 = sbr.rel (%p214_p2) target bundleno = 696 (0x2b8), region = 44  ;;  %v706_v3 = vpack.c.bf16 (!%p214_p2), %v258_v1, %v257_v0  ;;  %v260_v4 = vld [vmem:[%s886_s1 + $0x18] sm:$0xff] (!%p214_p2)  ;;  %p244_p3 = scmp.lt.s32.totalorder (!%p214_p2), %s619_s29, 7  ;;  %v360_v8 = vld [vmem:[%s888_s3] sm:$0xff] (!%p214_p2)  ;;  %v361_v9 = vld [vmem:[%s888_s3 + $0x8] sm:$0xff] (!%p214_p2)  ;;  %vm473_vm4 = vcmask (!%p214_p2), 392192  }
   0x7   : > { %v710_v5 = vpack.c.bf16 (!%p214_p2), %v260_v4, %v259_v2  ;;  %v714_v10 = vpack.c.bf16 (!%p214_p2), %v361_v9, %v360_v8  ;;  %v362_v11 = vld [vmem:[%s888_s3 + $0x10] sm:$0xff] (!%p214_p2)  ;;  %v363_v12 = vld [vmem:[%s888_s3 + $0x18] sm:$0xff] (!%p214_p2)  ;;  %v364_v13 = vld [vmem:[%s888_s3 + $0x20] sm:$0xff] (!%p214_p2)  ;;  %vm555_vm7 = vcmask (!%p214_p2), 130048  }
   0x8   : > { %707 = vmatprep.subr.bf16.mxu0 (!%p214_p2), %v706_v3  ;;  %v718_v14 = vpack.c.bf16 (!%p214_p2), %v363_v12, %v362_v11  ;;  %v365_v15 = vld [vmem:[%s888_s3 + $0x28] sm:$0xff] (!%p214_p2)  ;;  %v366_v17 = vld [vmem:[%s888_s3 + $0x30] sm:$0xff] (!%p214_p2)  ;;  %v367_v18 = vld [vmem:[%s888_s3 + $0x38] sm:$0xff] (!%p214_p2) }
   0x9   : > { %709 = vmatpush3.bf16.msra.mxu0 (!%p214_p2), %v706_v3  ;;  %715 = vmatprep.subr.bf16.mxu1 (!%p214_p2), %v714_v10  ;;  %v722_v16 = vpack.c.bf16 (!%p214_p2), %v365_v15, %v364_v13  ;;  %v726_v19 = vpack.c.bf16 (!%p214_p2), %v367_v18, %v366_v17  ;;  %v623_v20 = vld [vmem:[%s887_s2] ss:$0 sm:$0xff] (!%p214_p2)  ;;  %v468_v34 = vld [vmem:[%s890_s5 + $0x8] sm:$0xff] (!%p214_p2)  ;;  %v469_v36 = vld [vmem:[%s890_s5 + $0x10] sm:$0xff] (!%p214_p2) }
   0xa   : > { %711 = vmatprep.subr.bf16.mxu0 (!%p214_p2), %v710_v5  ;;  %717 = vmatpush3.bf16.msra.mxu1 (!%p214_p2), %v714_v10  ;;  %v467_v33 = vld [vmem:[%s890_s5] sm:$0xff] (!%p214_p2)  ;;  %v470_v37 = vld [vmem:[%s890_s5 + $0x18] sm:$0xff] (!%p214_p2)  ;;  %v472_v40 = vld [vmem:[%s890_s5 + $0x28] sm:$0xff] (!%p214_p2) }
   0xb   : > { %719 = vmatprep.subr.bf16.mxu1 (!%p214_p2), %v718_v14  ;;  %v730_v35 = vpack.c.bf16 (!%p214_p2), %v468_v34, %v467_v33  ;;  %v734_v38 = vpack.c.bf16 (!%p214_p2), %v470_v37, %v469_v36  ;;  %v471_v39 = vld [vmem:[%s890_s5 + $0x20] sm:$0xff] (!%p214_p2) }
   0xc   : > { %v738_v41 = vpack.c.bf16 (!%p214_p2), %v472_v40, %v471_v39  ;;  %v628_v42 = vld [vmem:[%s889_s4] ss:$0 sm:$0xff] (!%p214_p2) }
   0xd   : > { %s893_s29 = smov (!%p244_p3, %s619_s29), 7  ;;  %713 = vmatpush3.bf16.msra.mxu0 %v710_v5 }
   0xe   : > { %s620_s8 = sshll.u32 %s893_s29, 3  ;;  %721 = vmatpush3.bf16.msra.mxu1 %v718_v14  ;;  %731 = vmatprep.subr.bf16.mxu0 %v730_v35 }
   0xf   : > { %s247_s11 = scalar_lea.vmem %s885_s0, %s620_s8  ;;  %723 = vmatprep.subr.bf16.mxu1 %v722_v16  ;;  %s253_s26 = scalar_lea.vmem %s891_s6, %s620_s8 }
  0x10   : > { %v255_v6 = vld [vmem:[%s247_s11] sm:$0xff]  ;;  %v256_v7 = vld [vmem:[%s247_s11 + $0x8] sm:$0xff] }
  0x11   : > { %669 = vmatprep.mubr.msk.f32.mxu0 %vm268_vm0, %v255_v6 }
  0x12   : > { %670 = vmatmul.mubr.msk.f32.vlgmr.msra.gmra.mrb[0].mxu0 %vm268_vm0, %v256_v7  ;;  %725 = vmatpush3.bf16.msra.mxu1 %v722_v16 }
  0x13   : > { %727 = vmatprep.subr.bf16.mxu1 %v726_v19  ;;  %733 = vmatpush3.bf16.msra.mxu0 %v730_v35 }
  0x14   : > { %735 = vmatprep.subr.bf16.mxu0 %v734_v38 }
  0x16   : > { %729 = vmatpush3.bf16.msra.mxu1 %v726_v19 }
  0x17   : > { %737 = vmatpush3.bf16.msra.mxu0 %v734_v38 }
  0x18   : > { %739 = vmatprep.subr.bf16.mxu0 %v738_v41 }
  0x1b   : > { %741 = vmatpush3.bf16.msra.mxu0 %v738_v41 }
  0xe5   : > { %v671_v21 = vpop.f32.mrb[0].mxu0 }
  0xe6   : > { %v347_v22 = vadd.f32 %v671_v21, %v623_v20  ;;  %v341_v23 = vpop.f32.mrb[1].mxu0 }
  0xe7   : > { %v342_v24 = vadd.f32 %v623_v20, %v341_v23 }
  0xe8   : > { %v354_v25 = vmul.f32 1.442695, %v347_v22  ;;  %vm351_vm3 = vcmp.gt.f32.partialorder %v347_v22, 0.0 }
  0xe9   : > { %v352_v26 = vmul.f32 1.442695, %v342_v24  ;;  %vm350_vm2 = vcmp.gt.f32.partialorder %v342_v24, 0.0 }
  0xea   : > { %750 = vpow2.f32 %v354_v25 }
  0xeb   : > { %752 = vpow2.f32 %v352_v26 }
  0xf4   : > { %v751_v27 = vpop.eup %750 }
  0xf5   : > { %v753_v28 = vpop.eup %752  ;;  %v627_v29 = vadd.f32 -1.0, %v751_v27 }
  0xf6   : > { %v626_v30 = vadd.f32 -1.0, %v753_v28 }
  0xf7   : > { %v359_v32 = vsel %vm351_vm3, %v347_v22, %v627_v29 }
  0xf8   : > { %v358_v31 = vsel %vm350_vm2, %v342_v24, %v626_v30 }
  0xf9   : > { %688 = vmatprep.mubr.msk.f32.mxu1 %vm375_vm1, %v358_v31 }
  0xfa   : > { %689 = vmatmul.mubr.msk.f32.vlgmr.msra.gmra.mrb[0].mxu1 %vm375_vm1, %v359_v32 }
 0x1cd   : > { %v690_v43 = vpop.f32.mrb[0].mxu1 }
 0x1ce   : > { %v454_v44 = vadd.f32 %v690_v43, %v628_v42  ;;  %v448_v45 = vpop.f32.mrb[1].mxu1 }
 0x1cf   : > { %v449_v46 = vadd.f32 %v628_v42, %v448_v45 }
 0x1d0   : > { %v461_v47 = vmul.f32 1.442695, %v454_v44  ;;  %vm458_vm6 = vcmp.gt.f32.partialorder %v454_v44, 0.0 }
 0x1d1   : > { %v459_v48 = vmul.f32 1.442695, %v449_v46  ;;  %vm457_vm5 = vcmp.gt.f32.partialorder %v449_v46, 0.0 }
 0x1d2   : > { %754 = vpow2.f32 %v461_v47 }
 0x1d3   : > { %756 = vpow2.f32 %v459_v48 }
 0x1dc   : > { %v755_v49 = vpop.eup %754 }
 0x1dd   : > { %v757_v50 = vpop.eup %756  ;;  %v632_v51 = vadd.f32 -1.0, %v755_v49 }
 0x1de   : > { %v631_v52 = vadd.f32 -1.0, %v757_v50 }
 0x1df   : > { %v466_v54 = vsel %vm458_vm6, %v454_v44, %v632_v51 }
 0x1e0   : > { %v465_v53 = vsel %vm457_vm5, %v449_v46, %v631_v52 }
 0x1e1   : > { %703 = vmatprep.mubr.msk.f32.mxu0 %vm473_vm4, %v465_v53 }
 0x1e2   : > { %704 = vmatmul.mubr.msk.f32.vlgmr.msra.gmra.mrb[2].mxu0 %vm473_vm4, %v466_v54 }
 0x2b5   : > { %v705_v55 = vpop.f32.mrb[2].mxu0 }
 0x2b6   : > { %v546_v56 = vpop.f32.mrb[3].mxu0  ;;  %557 = vst.msk [vmem:[%s253_s26 + $0x8] sm:$0xff] %vm555_vm7, %v705_v55 }
 0x2b7   : > { %556 = vst.msk [vmem:[%s253_s26] sm:$0xff] %vm555_vm7, %v546_v56 }
 0x2b8 PF: > { %s16_s21 = sadd.s32 1, %s764_s21  }
 0x2b9   : > { %p13_p4 = scmp.ge.s32.totalorder %s16_s21, 6  }
 0x2bb   :  { %15 = sbr.rel (!%p13_p4) target bundleno = 1 (0x1), region = 74 }

</bundles_post_ra>
